<compile_context>
chip_gen: v7x
topology: tpu7x:2x2x1
jax: 0.10.0
libtpu: 0.0.40
codegen_flags: <defaults>
</compile_context>

<pallas_src>
import jax
import jax.numpy as jnp
from jax.experimental import pallas as pl
from jax.experimental.pallas import tpu as pltpu

# Above this many bytes the copy is split into a few independent DMAs (one
# semaphore each) so multiple DMA queues can run concurrently; below it a
# single descriptor has the least overhead.
_SPLIT_BYTES = 1 << 20  # 1 MiB
_MAX_CHUNKS = 4


def _make_copy_kernel(chunks):
    """Build an identity kernel made of direct HBM->HBM async copies.

    `chunks` is None for a single whole-array DMA, or a static list of
    (start, size) slices along the leading dimension.
    Returns (kernel_fn, semaphore_scratch_spec).
    """
    if chunks is None:
        def kernel(x_ref, o_ref, sem):
            cp = pltpu.make_async_copy(x_ref, o_ref, sem)
            cp.start()
            cp.wait()

        return kernel, pltpu.SemaphoreType.DMA

    def kernel(x_ref, o_ref, sems):
        cps = []
        # Start all DMAs first (they run concurrently on the DMA engines),
        # then wait on all of them.
        for idx, (start, size) in enumerate(chunks):
            cp = pltpu.make_async_copy(
                x_ref.at[pl.ds(start, size)],
                o_ref.at[pl.ds(start, size)],
                sems.at[idx],
            )
            cp.start()
            cps.append(cp)
        for cp in cps:
            cp.wait()

    return kernel, pltpu.SemaphoreType.DMA((len(chunks),))


@jax.jit
def basic_network_forward(x: jax.Array) -> jax.Array:
    """Pallas identity kernel standing in for BasicNetwork.forward (a no-op).

    Works for any shape/dtype: the array is passed to the kernel untiled
    (memory_space=pl.ANY) and copied HBM->HBM by the DMA engines, avoiding
    the HBM->VMEM->vreg->VMEM->HBM detour of a blocked streaming copy.
    """
    if x.size == 0:
        # Nothing to copy; zero-sized DMAs are pointless (and untested).
        return x

    nbytes = x.size * x.dtype.itemsize
    dim0 = x.shape[0] if x.ndim else 1

    if nbytes <= _SPLIT_BYTES or dim0 < 2:
        chunks = None  # single whole-array DMA (covers 0-d / tiny inputs)
    else:
        n = min(_MAX_CHUNKS, dim0)
        base, rem = divmod(dim0, n)
        chunks = []
        start = 0
        for i in range(n):
            size = base + (1 if i < rem else 0)
            chunks.append((start, size))
            start += size

    kernel, sem_spec = _make_copy_kernel(chunks)

    return pl.pallas_call(
        kernel,
        out_shape=jax.ShapeDtypeStruct(x.shape, x.dtype),
        in_specs=[pl.BlockSpec(memory_space=pl.ANY)],
        out_specs=pl.BlockSpec(memory_space=pl.ANY),
        scratch_shapes=[sem_spec],
    )(x)


if __name__ == "__main__":
    key = jax.random.PRNGKey(0)
    # Small NCHW input consistent with a conv-style GAN network input.
    x = jax.random.normal(key, (2, 4, 16, 16), dtype=jnp.float32)

    y = basic_network_forward(x)
    jax.block_until_ready(y)

    # Sanity check: exact identity semantics.
    assert y.shape == x.shape and y.dtype == x.dtype
    assert bool(jnp.array_equal(y, x))

    print("KERNEL_OK")
</pallas_src>

<mosaic_0001>
module attributes {stable_mosaic.version = 11 : i64} {
  func.func @kernel(%arg0: memref<2x4x16x16xf32, #tpu.memory_space<any>>, %arg1: memref<2x4x16x16xf32, #tpu.memory_space<any>>, %arg2: memref<!tpu.dma_semaphore, #tpu.memory_space<semaphore_mem>>) attributes {dimension_semantics = [], scalar_prefetch = 0 : i64, scratch_operands = 1 : i64, tpu.core_type = #tpu.core_type<tc>} {
    tpu.enqueue_dma source(%arg0 : memref<2x4x16x16xf32, #tpu.memory_space<any>>) target(%arg1 : memref<2x4x16x16xf32, #tpu.memory_space<any>>) target_semaphore(%arg2 : memref<!tpu.dma_semaphore, #tpu.memory_space<semaphore_mem>>)
    tpu.wait_dma2 semaphore(%arg2 : memref<!tpu.dma_semaphore, #tpu.memory_space<semaphore_mem>>) src(%arg0 : memref<2x4x16x16xf32, #tpu.memory_space<any>>) dst(%arg1 : memref<2x4x16x16xf32, #tpu.memory_space<any>>)
    return
  }
}

</mosaic_0001>

<bundles_post_ra>
// kernel: basic_network_forward.1
= control target key start
LH: loop header
LB: loop body
LE: loop exit
PB: predicated region body
PF: predicated region fallthrough
CT: control target
= control target key end

     0   :  { %s36_s6 = smov [#allocation2]   ;;  %s37_s7 = smov [#allocation3]   ;;  %s55_s0 = inlined_call_operand.hbm [shape: f32[2,4,16,16], index: 0, kind: input, shape index: {}]   ;;  %s56_s1 = inlined_call_operand.hbm [shape: f32[2,4,16,16], index: 1, kind: output, shape index: {}]  }
   0x1   :  { %s38_s8 = smov 0  }
   0x2   :  { %18 = dma.general %s55_s0, 2048, %s56_s1, %s36_s6, %s37_s7, [#allocation4], %s38_s8, 0  }
   0x3   :  { %34 = dma.done.wait [#allocation2], 2048 }
   0x4   :  { %35 = vsyncadd [#allocation2], 4294965248 }
   0x5   :  { %24 = vsyncmov [#allocation2] }
   0x8   :  { %s25_s13 = vpop.sfrf %24 }
   0x9   :  { %p30_p0 = scmp.ne.s32.totalorder %s25_s13, 0 }
   0xb   :  { %29 = shalt.err (%p30_p0)  }

</bundles_post_ra>
